<compile_context>
chip_gen: v6e
topology: v6e:2x2x1
jax: 0.10.0
libtpu: 0.0.40
codegen_flags: <defaults>
</compile_context>

<pallas_src>
import jax
import jax.numpy as jnp
from jax.experimental import pallas as pl
from jax.experimental.pallas import tpu as pltpu


def _add_pos_kernel(x_ref, pos_ref, o_ref):
    # x_ref / o_ref: (tb, ts, te); pos_ref: (ts, te), broadcast over batch.
    o_ref[...] = x_ref[...] + pos_ref[...][None]


def _add_pos_flat_kernel(x_ref, pos_ref, o_ref):
    # x_ref / o_ref: (tb, tf); pos_ref: (1, tf), broadcast over batch rows.
    o_ref[...] = x_ref[...] + pos_ref[...]


def _round_down(x, m):
    return (x // m) * m


_TARGET_X_BLOCK_BYTES = 4 * 1024 * 1024   # ~4 MiB of x per grid step


def positional_encoding(x, pos_embedding):
    """x: (B, S, E); pos_embedding: (1, P+1, E), S <= P+1  ->  (B, S, E)."""
    B, S, E = x.shape
    # Only XLA-side op: slice the small positional table to the used length.
    pos = pos_embedding[0, :S, :].astype(x.dtype)            # (S, E)
    itemsize = jnp.dtype(x.dtype).itemsize

    if E >= 128:
        # ---- Lane-dense path: tile (B, S, E) directly. ----
        te = E if E <= 1024 else 1024          # full E, or multiple of 128
        ts = S if S <= 512 else 512            # full S, or multiple of 8
        row_bytes = ts * te * itemsize
        tb = max(1, min(B, 8, _TARGET_X_BLOCK_BYTES // row_bytes))

        grid = (pl.cdiv(S, ts), pl.cdiv(E, te), pl.cdiv(B, tb))  # batch innermost
        x_block_bytes = tb * row_bytes
        vmem_need = 2 * (2 * x_block_bytes + row_bytes)          # dbl-buffered x+out+pos

        return pl.pallas_call(
            _add_pos_kernel,
            out_shape=jax.ShapeDtypeStruct((B, S, E), x.dtype),
            grid=grid,
            in_specs=[
                # pos block index is independent of b -> no re-fetch across b.
                pl.BlockSpec((tb, ts, te), lambda s, e, b: (b, s, e)),  # x
                pl.BlockSpec((ts, te), lambda s, e, b: (s, e)),         # pos
            ],
            out_specs=pl.BlockSpec((tb, ts, te), lambda s, e, b: (b, s, e)),
            compiler_params=pltpu.CompilerParams(
                dimension_semantics=("parallel", "parallel", "parallel"),
                vmem_limit_bytes=max(vmem_need + (4 << 20), 16 << 20)),
        )(x, pos)

    # ---- Narrow-E path (E < 128): fuse (S, E) -> F so stores are lane dense. ----
    f_dim = S * E
    x2 = x.reshape(B, f_dim)                   # row-major reshape: free
    pos2 = pos.reshape(1, f_dim)

    tf = f_dim if f_dim <= 8192 else 8192      # full F, or multiple of 128
    row_bytes = tf * itemsize
    tb_cap = max(1, min(8 * 1024, _TARGET_X_BLOCK_BYTES // row_bytes))
    if B <= tb_cap:
        tb = B                                  # full batch -> always layout-legal
    else:
        tb = max(8, _round_down(min(tb_cap, B), 8))   # (8,128) sublane rule

    grid = (pl.cdiv(f_dim, tf), pl.cdiv(B, tb))        # batch innermost
    vmem_need = 2 * (2 * tb * row_bytes + row_bytes)

    out2 = pl.pallas_call(
        _add_pos_flat_kernel,
        out_shape=jax.ShapeDtypeStruct((B, f_dim), x.dtype),
        grid=grid,
        in_specs=[
            pl.BlockSpec((tb, tf), lambda f, b: (b, f)),   # x (fused)
            pl.BlockSpec((1, tf), lambda f, b: (0, f)),    # pos (fused, b-invariant)
        ],
        out_specs=pl.BlockSpec((tb, tf), lambda f, b: (b, f)),
        compiler_params=pltpu.CompilerParams(
            dimension_semantics=("parallel", "parallel"),
            vmem_limit_bytes=max(vmem_need + (4 << 20), 16 << 20)),
    )(x2, pos2)
    return out2.reshape(B, S, E)


if __name__ == "__main__":
    key = jax.random.PRNGKey(0)

    # --- Test 1: module-sized config (narrow E -> fused lane-dense path). ---
    num_patches = 16
    embed_dim = 32
    batch = 2
    seq = num_patches + 1   # CLS token + patches (uses the full pos table)

    kx, kp, kx2, kp2 = jax.random.split(key, 4)
    x = jax.random.normal(kx, (batch, seq, embed_dim), jnp.float32)
    # nn.Parameter is zero-initialized in __init__, but any learned values are
    # valid at forward time; use random values so the add is actually tested.
    pos_embedding = jax.random.normal(
        kp, (1, num_patches + 1, embed_dim), jnp.float32)

    out = positional_encoding(x, pos_embedding)
    jax.block_until_ready(out)
    ref = x + pos_embedding[:, :seq, :]
    assert out.shape == (batch, seq, embed_dim)
    assert out.dtype == jnp.float32
    assert jnp.allclose(out, ref, atol=1e-6, rtol=1e-6)

    # --- Test 2: wide-E config exercising the 3-D batch-packed path. ---
    embed_dim2 = 256
    x2 = jax.random.normal(kx2, (batch, seq, embed_dim2), jnp.float32)
    pos_embedding2 = jax.random.normal(
        kp2, (1, num_patches + 1, embed_dim2), jnp.float32)

    out2 = positional_encoding(x2, pos_embedding2)
    jax.block_until_ready(out2)
    ref2 = x2 + pos_embedding2[:, :seq, :]
    assert out2.shape == (batch, seq, embed_dim2)
    assert jnp.allclose(out2, ref2, atol=1e-6, rtol=1e-6)

    print("KERNEL_OK")
</pallas_src>

<mosaic_0001>
module attributes {stable_mosaic.version = 11 : i64} {
  func.func @_add_pos_flat_kernel(%arg0: i32, %arg1: i32, %arg2: memref<2x544xf32, #tpu.memory_space<vmem>>, %arg3: memref<1x544xf32, #tpu.memory_space<vmem>>, %arg4: memref<2x544xf32, #tpu.memory_space<vmem>>) attributes {dimension_semantics = [#tpu.dimension_semantics<parallel>, #tpu.dimension_semantics<parallel>], iteration_bounds = array<i64: 1, 1>, scalar_prefetch = 0 : i64, scratch_operands = 0 : i64, tpu.core_type = #tpu.core_type<tc>, window_params = [{transform_indices = @transform_0, window_bounds = array<i64: 2, 544>}, {transform_indices = @transform_1, window_bounds = array<i64: 1, 544>}, {transform_indices = @transform_2, window_bounds = array<i64: 2, 544>}]} {
    %c0 = arith.constant 0 : index
    %c0_0 = arith.constant 0 : index
    %0 = vector.load %arg2[%c0, %c0_0] : memref<2x544xf32, #tpu.memory_space<vmem>>, vector<2x544xf32>
    %c0_1 = arith.constant 0 : index
    %c0_2 = arith.constant 0 : index
    %1 = vector.load %arg3[%c0_1, %c0_2] : memref<1x544xf32, #tpu.memory_space<vmem>>, vector<1x544xf32>
    %2 = vector.broadcast %1 : vector<1x544xf32> to vector<2x544xf32>
    %3 = arith.addf %0, %2 : vector<2x544xf32>
    %c0_3 = arith.constant 0 : index
    %c0_4 = arith.constant 0 : index
    %4 = vector.load %arg4[%c0_3, %c0_4] : memref<2x544xf32, #tpu.memory_space<vmem>>, vector<2x544xf32>
    tpu.vector_store %arg4[%c0_3, %c0_4], %3 {strides = array<i32>} : memref<2x544xf32, #tpu.memory_space<vmem>>, vector<2x544xf32>,
    return
  }
  func.func @transform_0(%arg0: i32, %arg1: i32) -> (i32, i32) {
    %c0_i32 = arith.constant 0 : i32
    return %arg1, %arg0 : i32, i32
  }
  func.func @transform_1(%arg0: i32, %arg1: i32) -> (i32, i32) {
    %c0_i32 = arith.constant 0 : i32
    %c0_i32_0 = arith.constant 0 : i32
    return %c0_i32, %arg0 : i32, i32
  }
  func.func @transform_2(%arg0: i32, %arg1: i32) -> (i32, i32) {
    %c0_i32 = arith.constant 0 : i32
    return %arg1, %arg0 : i32, i32
  }
}

</mosaic_0001>

<bundles_post_ra>
// kernel: tpu_custom_call.1
= control target key start
LH: loop header
LB: loop body
LE: loop exit
PB: predicated region body
PF: predicated region fallthrough
CT: control target
= control target key end

     0   :  { %7 = vsyncpa [#allocation3], 0  ;;  %s205_s0 = inlined_call_operand.hbm [shape: f32[2,544], index: 0, kind: input, shape index: {}]   ;;  %s206_s1 = inlined_call_operand.hbm [shape: f32[1,544], index: 1, kind: input, shape index: {}]   ;;  %s207_s2 = inlined_call_operand.hbm [shape: f32[2,544], index: 2, kind: output, shape index: {}]  }
   0x1   :  { %8 = vsyncpa [#allocation6], 0 }
   0x2   :  { %9 = vsyncpa [#allocation4], 0  ;;  %s177_s9 = smov [#allocation2]   ;;  %s178_s11 = smov [#allocation5]  }
   0x3   :  { %s16_s10 = sshll.u32 %s177_s9, 4  ;;  %s26_s12 = sshll.u32 %s178_s11, 4  ;;  %s17_s10 = int_to_ptr.vmem [resolvable:$true] %s16_s10  ;;  %s27_s12 = int_to_ptr.vmem [resolvable:$true] %s26_s12 }
   0x4   :  { %s119_s13 = scalar_lea.vmem %s17_s10, 160  ;;  %p124_p1 = scmp.lt.s32.totalorder %s17_s10, %s17_s10 }
   0x5   :  { %p120_p0 = scmp.ne.s32.totalorder %s17_s10, %s119_s13  ;;  %p125_p2 = scmp.lt.s32.totalorder %s119_s13, %s119_s13 }
   0x7   :  { %p126_p3 = por %p125_p2, %p124_p1 }
   0x9   :  { %p127_p4 = pnand %p126_p3, %p120_p0 }
   0xb   :  { %130 = shalt.err (!%p127_p4)
}
   0xc   :  { %19 = dma.hbm_to_vmem [thread:$0]  %s205_s0, 160, %s17_s10, [#allocation3]  }
   0xd   :  { %s139_s16 = scalar_lea.vmem %s27_s12, 80  ;;  %s143_s17 = scalar_lea.vmem %s27_s12, 96 }
   0xe   :  { %p140_p5 = scmp.ne.s32.totalorder %s27_s12, %s139_s16  ;;  %p144_p6 = scmp.lt.s32.totalorder %s27_s12, %s27_s12 }
   0xf   :  { %p145_p7 = scmp.lt.s32.totalorder %s143_s17, %s139_s16 }
  0x11   :  { %p146_p8 = por %p145_p7, %p144_p6 }
  0x13   :  { %p147_p9 = pnand %p146_p8, %p140_p5 }
  0x15   :  { %150 = shalt.err (!%p147_p9)
}
  0x16   :  { %29 = dma.hbm_to_vmem [thread:$0]  %s206_s1, 80, %s27_s12, [#allocation6]  }
  0x17   :  { %171 = dma.done.wait [#allocation3], 160  }
  0x18   :  { %172 = vsyncadd [#allocation3], 4294967136 }
  0x19   :  { %173 = dma.done.wait [#allocation6], 80  }
  0x1a   :  { %174 = vsyncadd [#allocation6], 4294967216  ;;  %v40_v0 = vlaneseq  ;;  %v179_v1 = vmov 1983009808   ;;  %v38_v10 = vld [vmem:[#allocation5] sm:$0x1f] }
  0x1b   :  { %v63_v2 = vunpack.c.l.s4 %v179_v1  ;;  %v37_v19 = vld [vmem:[#allocation2 + $0x8] sm:$0x3]  ;;  %vm89_vm0 = vcmask 254976   ;;  %v36_v23 = vld [vmem:[#allocation2] sm:$0xff]  ;;  %s180_s0 = smov [#allocation7]  }
  0x1c   :  { %v41_v3 = vshrl.u32 %v40_v0, 7  ;;  %s97_s1 = sshll.u32 %s180_s0, 4  ;;  %s98_s1 = int_to_ptr.vmem [resolvable:$true] %s97_s1 }
  0x1d   :  { %v64_v4 = vunpack.c.0.s8 %v63_v2  ;;  %s151_s20 = scalar_lea.vmem %s98_s1, 160  ;;  %p156_p11 = scmp.lt.s32.totalorder %s98_s1, %s98_s1 }
  0x1e   :  { %v42_v5 = vsub.s32 0, %v41_v3  ;;  %v46_v6 = vsub.s32 1, %v41_v3  ;;  %v50_v7 = vsub.s32 2, %v41_v3  ;;  %v54_v8 = vsub.s32 3, %v41_v3  ;;  %p152_p10 = scmp.ne.s32.totalorder %s98_s1, %s151_s20  ;;  %p157_p12 = scmp.lt.s32.totalorder %s151_s20, %s151_s20 }
  0x1f   :  { %v58_v9 = vsub.s32 4, %v41_v3  ;;  %v67_v11 = vsub.s32 %v64_v4, %v41_v3 }
  0x20   :  { %v43_v12 = vrot.slane %v38_v10, %v42_v5  ;;  %v47_v13 = vrot.slane %v38_v10, %v46_v6  ;;  %v51_v14 = vrot.slane %v38_v10, %v50_v7  ;;  %v55_v15 = vrot.slane %v38_v10, %v54_v8  ;;  %p158_p13 = por %p157_p12, %p156_p11 }
  0x21   :  { %v59_v16 = vrot.slane %v38_v10, %v58_v9 }
  0x22   :  { %v60_v17 = vcombine.low %v43_v12, %v47_v13  ;;  %v61_v18 = vcombine.low %v51_v14, %v55_v15  ;;  %p159_p0 = pnand %p158_p13, %p152_p10 }
  0x23   :  { %v83_v20 = vrot.slane %v59_v16, %v67_v11 }
  0x24   :  { %v68_v21 = vrot.slane %v60_v17, %v67_v11  ;;  %v75_v22 = vrot.slane %v61_v18, %v67_v11 }
  0x25   :  { %v87_v24 = vadd.f32 %v83_v20, %v37_v19 }
  0x26   :  { %v76_v25 = vcombine.low %v68_v21, %v75_v22 }
  0x27   :  { %90 = vst.msk [vmem:[#allocation7 + $0x8] sm:$0x3] %vm89_vm0, %v87_v24 }
  0x28   :  { %v86_v26 = vadd.f32 %v76_v25, %v36_v23 }
  0x2a   :  { %88 = vst [vmem:[#allocation7] sm:$0xff] %v86_v26 }
  0x2b   :  { %162 = shalt.err (!%p159_p0)
}
  0x2c   :  { %100 = dma.vmem_to_hbm [thread:$0]  %s98_s1, 160, %s207_s2, [#allocation4]  }
  0x2d   :  { %175 = dma.done.wait [#allocation4], 160  }
  0x2e   :  { %176 = vsyncadd [#allocation4], 4294967136 }
  0x2f   :  { %104 = vsyncpa [#allocation3], 1 }
  0x30   :  { %105 = vsyncpa [#allocation6], 1 }
  0x31   :  { %106 = vsyncpa [#allocation4], 1 }

</bundles_post_ra>
